<compile_context>
chip_gen: v7x
topology: tpu7x:2x2x1
jax: 0.10.0
libtpu: 0.0.40
codegen_flags: <defaults>
</compile_context>

<pallas_src>
import functools
import math

import jax
import jax.numpy as jnp
from jax.experimental import pallas as pl
from jax.experimental.pallas import tpu as pltpu


LANE = 128  # TPU lane width


def _round_up(n, m):
    return ((n + m - 1) // m) * m


def gttn_fwd_kernel(task_ref, x_ref, w1_ref, b1_ref, w2_ref, b2_ref, out_ref):
    # task_ref is the scalar-prefetch operand; it is consumed by the index
    # maps (per-task head selection) and unused in the body.
    del task_ref
    # hidden = relu(x @ W1 + b1)   (bf16 MXU operands, f32 accumulation)
    x_bf = x_ref[...].astype(jnp.bfloat16)
    h = jnp.dot(x_bf, w1_ref[...], preferred_element_type=jnp.float32)
    h = jnp.maximum(h + b1_ref[...], 0.0)                     # f32 VPU path
    # out = hidden @ W2 + b2       (F.linear semantics; W2 pre-transposed)
    o = jnp.dot(h.astype(jnp.bfloat16), w2_ref[...],
                preferred_element_type=jnp.float32)
    out_ref[...] = (o + b2_ref[...]).astype(out_ref.dtype)


def prepare_params(hidden_w, hidden_b, cls_weight, cls_bias):
    """One-time (cached) weight prep: transpose, zero-pad, cast to bf16.

    hidden_w   : (H, D)        torch nn.Linear layout
    hidden_b   : (H,)
    cls_weight : (T, C, H)
    cls_bias   : (T, C)
    returns (w1, b1, w2, b2):
      w1 (D, Hp) bf16, b1 (1, Hp) f32, w2 (T, Hp, Cp) bf16, b2 (T, 1, Cp) f32
    """
    H, D = hidden_w.shape
    T, C, _ = cls_weight.shape
    Hp = _round_up(H, LANE)
    Cp = _round_up(C, LANE)

    w1 = jnp.zeros((D, Hp), jnp.float32).at[:, :H].set(
        jnp.transpose(hidden_w).astype(jnp.float32))
    b1 = jnp.zeros((1, Hp), jnp.float32).at[:, :H].set(
        hidden_b.astype(jnp.float32))
    w2 = jnp.zeros((T, Hp, Cp), jnp.float32).at[:, :H, :C].set(
        jnp.transpose(cls_weight, (0, 2, 1)).astype(jnp.float32))
    b2 = jnp.zeros((T, 1, Cp), jnp.float32).at[:, 0, :C].set(
        cls_bias.astype(jnp.float32))

    return (w1.astype(jnp.bfloat16), b1, w2.astype(jnp.bfloat16), b2)


@functools.partial(jax.jit, static_argnames=("class_num",))
def gttn_weight_net_forward(inputs, w1, b1, w2, b2, task_index, *, class_num):
    """Forward of GTTN_weight_net (relu(x@W1^T+b1) @ W2[task]^T + b2[task]).

    inputs     : (B, D) or (D,)        float32
    w1,b1,w2,b2: prepared params (see prepare_params)
    task_index : int32 scalar (traced -> no recompile per task)
    returns    : (B, class_num) float32
    """
    if inputs.ndim < 2:
        inputs = inputs[None, :]
    x = inputs.astype(jnp.float32)

    B, D = x.shape
    Hp = w1.shape[1]
    Cp = w2.shape[2]
    task = jnp.asarray(task_index, jnp.int32).reshape((1,))

    out_pad = pl.pallas_call(
        gttn_fwd_kernel,
        out_shape=jax.ShapeDtypeStruct((B, Cp), jnp.float32),
        grid_spec=pltpu.PrefetchScalarGridSpec(
            num_scalar_prefetch=1,
            grid=(1,),
            in_specs=[
                pl.BlockSpec((B, D), lambda i, t: (0, 0)),
                pl.BlockSpec((D, Hp), lambda i, t: (0, 0)),
                pl.BlockSpec((1, Hp), lambda i, t: (0, 0)),
                # Per-task head picked by the scalar-prefetched task index.
                pl.BlockSpec((None, Hp, Cp), lambda i, t: (t[0], 0, 0)),
                pl.BlockSpec((None, 1, Cp), lambda i, t: (t[0], 0, 0)),
            ],
            out_specs=pl.BlockSpec((B, Cp), lambda i, t: (0, 0)),
        ),
    )(task, x, w1, b1, w2, b2)

    return out_pad[:, :class_num]


def init_params(key, input_dim, hidden_dim, class_num, task_num):
    """Deterministic parameter init mirroring the torch module's shapes."""
    k1, k2, k3, k4, k5 = jax.random.split(key, 5)

    bound1 = 1.0 / math.sqrt(input_dim)
    hidden_w = jax.random.uniform(k1, (hidden_dim, input_dim),
                                  minval=-bound1, maxval=bound1,
                                  dtype=jnp.float32)
    hidden_b = jax.random.uniform(k2, (hidden_dim,),
                                  minval=-bound1, maxval=bound1,
                                  dtype=jnp.float32)

    bound2 = 1.0 / math.sqrt(hidden_dim)
    cls_weight = jax.random.uniform(k3, (task_num, class_num, hidden_dim),
                                    minval=-bound2, maxval=bound2,
                                    dtype=jnp.float32)
    cls_bias = jax.random.uniform(k4, (task_num, class_num),
                                  minval=-bound2, maxval=bound2,
                                  dtype=jnp.float32)

    norm_weight = jax.random.normal(k5, (15,), dtype=jnp.float32)
    # TODO(synk): get_regular_term needs SVD (nuclear norms of tensor unfoldings);
    # there is no Pallas equivalent, so only the forward pass is a kernel.
    return hidden_w, hidden_b, cls_weight, cls_bias, norm_weight


if __name__ == "__main__":
    # Small shapes consistent with the module: hidden_dim = 7*7*4 = 196
    # (implied by the reshape in get_regular_term), class_num = 4, task_num = 3.
    B, INPUT_DIM, HIDDEN_DIM, CLASS_NUM, TASK_NUM = 8, 64, 196, 4, 3

    key = jax.random.PRNGKey(0)
    kx, kp = jax.random.split(key)
    x = jax.random.normal(kx, (B, INPUT_DIM), dtype=jnp.float32)
    hidden_w, hidden_b, cls_weight, cls_bias, _ = init_params(
        kp, INPUT_DIM, HIDDEN_DIM, CLASS_NUM, TASK_NUM)

    # One-time weight prep (cached across forward calls).
    w1p, b1p, w2p, b2p = prepare_params(hidden_w, hidden_b, cls_weight, cls_bias)

    hp = jax.lax.Precision.HIGHEST
    for ti in (1, 2):   # same compiled kernel serves every task index
        task = jnp.int32(ti)
        out = gttn_weight_net_forward(x, w1p, b1p, w2p, b2p, task,
                                      class_num=CLASS_NUM)
        out = jax.block_until_ready(out)
        assert out.shape == (B, CLASS_NUM)

        # Tight check: reference replicating the kernel's bf16-operand /
        # f32-accumulate arithmetic.
        xq = x.astype(jnp.bfloat16).astype(jnp.float32)
        w1q = hidden_w.astype(jnp.bfloat16).astype(jnp.float32)
        hq = jnp.maximum(jnp.dot(xq, w1q.T, precision=hp) + hidden_b, 0.0)
        hq = hq.astype(jnp.bfloat16).astype(jnp.float32)
        w2q = cls_weight[ti].astype(jnp.bfloat16).astype(jnp.float32)
        out_q = jnp.dot(hq, w2q.T, precision=hp) + cls_bias[ti]
        assert jnp.allclose(out, out_q, atol=1e-3, rtol=1e-3)

        # Loose check: full-f32 reference (original module semantics).
        h_ref = jnp.maximum(jnp.dot(x, hidden_w.T, precision=hp) + hidden_b, 0.0)
        out_ref = jnp.dot(h_ref, cls_weight[ti].T, precision=hp) + cls_bias[ti]
        assert jnp.allclose(out, out_ref, atol=3e-2, rtol=3e-2)

    print("KERNEL_OK")
</pallas_src>

<mosaic_0001>
module attributes {stable_mosaic.version = 11 : i64} {
  func.func @gttn_fwd_kernel(%arg0: i32, %arg1: memref<1xi32, #tpu.memory_space<smem>>, %arg2: memref<8x64xf32, #tpu.memory_space<vmem>>, %arg3: memref<64x256xbf16, #tpu.memory_space<vmem>>, %arg4: memref<1x256xf32, #tpu.memory_space<vmem>>, %arg5: memref<1x256x128xbf16, #tpu.memory_space<vmem>>, %arg6: memref<1x1x128xf32, #tpu.memory_space<vmem>>, %arg7: memref<8x128xf32, #tpu.memory_space<vmem>>) attributes {dimension_semantics = [#tpu.dimension_semantics<arbitrary>], iteration_bounds = array<i64: 1>, scalar_prefetch = 1 : i64, scratch_operands = 0 : i64, tpu.core_type = #tpu.core_type<tc>, window_params = [{pipeline_mode = #tpu.pipeline_mode<synchronous>, transform_indices = @transform_0, window_bounds = array<i64: 8, 64>}, {pipeline_mode = #tpu.pipeline_mode<synchronous>, transform_indices = @transform_1, window_bounds = array<i64: 64, 256>}, {pipeline_mode = #tpu.pipeline_mode<synchronous>, transform_indices = @transform_2, window_bounds = array<i64: 1, 256>}, {transform_indices = @transform_3, window_bounds = array<i64: 1, 256, 128>}, {transform_indices = @transform_4, window_bounds = array<i64: 1, 1, 128>}, {pipeline_mode = #tpu.pipeline_mode<synchronous>, transform_indices = @transform_5, window_bounds = array<i64: 8, 128>}]} {
    %c0 = arith.constant 0 : index
    %c0_0 = arith.constant 0 : index
    %0 = vector.load %arg2[%c0, %c0_0] : memref<8x64xf32, #tpu.memory_space<vmem>>, vector<8x64xf32>
    %1 = arith.truncf %0 : vector<8x64xf32> to vector<8x64xbf16>
    %c0_1 = arith.constant 0 : index
    %c0_2 = arith.constant 0 : index
    %2 = vector.load %arg3[%c0_1, %c0_2] : memref<64x256xbf16, #tpu.memory_space<vmem>>, vector<64x256xbf16>
    %cst = arith.constant dense<0.000000e+00> : vector<8x256xf32>
    %3 = tpu.matmul %1, %2, %cst {dimension_numbers = #tpu.dot_dimension_numbers<[1], [0], [0], [1], [0, 0, 1, 1], [], []>} : vector<8x64xbf16>, vector<64x256xbf16>, vector<8x256xf32> -> vector<8x256xf32>
    %c0_3 = arith.constant 0 : index
    %c0_4 = arith.constant 0 : index
    %4 = vector.load %arg4[%c0_3, %c0_4] : memref<1x256xf32, #tpu.memory_space<vmem>>, vector<1x256xf32>
    %5 = vector.broadcast %4 : vector<1x256xf32> to vector<8x256xf32>
    %6 = arith.addf %3, %5 : vector<8x256xf32>
    %cst_5 = arith.constant 0.000000e+00 : f32
    %7 = vector.broadcast %cst_5 : f32 to vector<8x256xf32>
    %8 = arith.maximumf %6, %7 : vector<8x256xf32>
    %9 = arith.truncf %8 : vector<8x256xf32> to vector<8x256xbf16>
    %c0_6 = arith.constant 0 : index
    %c0_7 = arith.constant 0 : index
    %c0_8 = arith.constant 0 : index
    %10 = vector.load %arg5[%c0_6, %c0_7, %c0_8] : memref<1x256x128xbf16, #tpu.memory_space<vmem>>, vector<1x256x128xbf16>
    %11 = vector.shape_cast %10 : vector<1x256x128xbf16> to vector<256x128xbf16>
    %cst_9 = arith.constant dense<0.000000e+00> : vector<8x128xf32>
    %12 = tpu.matmul %9, %11, %cst_9 {dimension_numbers = #tpu.dot_dimension_numbers<[1], [0], [0], [1], [0, 0, 1, 1], [], []>} : vector<8x256xbf16>, vector<256x128xbf16>, vector<8x128xf32> -> vector<8x128xf32>
    %c0_10 = arith.constant 0 : index
    %c0_11 = arith.constant 0 : index
    %c0_12 = arith.constant 0 : index
    %13 = vector.load %arg6[%c0_10, %c0_11, %c0_12] : memref<1x1x128xf32, #tpu.memory_space<vmem>>, vector<1x1x128xf32>
    %14 = vector.shape_cast %13 : vector<1x1x128xf32> to vector<1x128xf32>
    %15 = vector.broadcast %14 : vector<1x128xf32> to vector<8x128xf32>
    %16 = arith.addf %12, %15 : vector<8x128xf32>
    %c0_13 = arith.constant 0 : index
    %c0_14 = arith.constant 0 : index
    %17 = vector.load %arg7[%c0_13, %c0_14] : memref<8x128xf32, #tpu.memory_space<vmem>>, vector<8x128xf32>
    tpu.vector_store %arg7[%c0_13, %c0_14], %16 {strides = array<i32>} : memref<8x128xf32, #tpu.memory_space<vmem>>, vector<8x128xf32>,
    return
  }
  func.func @transform_0(%arg0: i32, %arg1: memref<1xi32, #tpu.memory_space<smem>>) -> (i32, i32) {
    %c0_i32 = arith.constant 0 : i32
    %c0_i32_0 = arith.constant 0 : i32
    %c0_i32_1 = arith.constant 0 : i32
    return %c0_i32, %c0_i32_0 : i32, i32
  }
  func.func @transform_1(%arg0: i32, %arg1: memref<1xi32, #tpu.memory_space<smem>>) -> (i32, i32) {
    %c0_i32 = arith.constant 0 : i32
    %c0_i32_0 = arith.constant 0 : i32
    %c0_i32_1 = arith.constant 0 : i32
    return %c0_i32, %c0_i32_0 : i32, i32
  }
  func.func @transform_2(%arg0: i32, %arg1: memref<1xi32, #tpu.memory_space<smem>>) -> (i32, i32) {
    %c0_i32 = arith.constant 0 : i32
    %c0_i32_0 = arith.constant 0 : i32
    %c0_i32_1 = arith.constant 0 : i32
    return %c0_i32, %c0_i32_0 : i32, i32
  }
  func.func @transform_3(%arg0: i32, %arg1: memref<1xi32, #tpu.memory_space<smem>>) -> (i32, i32, i32) {
    %c0 = arith.constant 0 : index
    %0 = memref.load %arg1[%c0] : memref<1xi32, #tpu.memory_space<smem>>
    %c0_i32 = arith.constant 0 : i32
    %c0_i32_0 = arith.constant 0 : i32
    %c0_i32_1 = arith.constant 0 : i32
    return %0, %c0_i32, %c0_i32_0 : i32, i32, i32
  }
  func.func @transform_4(%arg0: i32, %arg1: memref<1xi32, #tpu.memory_space<smem>>) -> (i32, i32, i32) {
    %c0 = arith.constant 0 : index
    %0 = memref.load %arg1[%c0] : memref<1xi32, #tpu.memory_space<smem>>
    %c0_i32 = arith.constant 0 : i32
    %c0_i32_0 = arith.constant 0 : i32
    %c0_i32_1 = arith.constant 0 : i32
    return %0, %c0_i32, %c0_i32_0 : i32, i32, i32
  }
  func.func @transform_5(%arg0: i32, %arg1: memref<1xi32, #tpu.memory_space<smem>>) -> (i32, i32) {
    %c0_i32 = arith.constant 0 : i32
    %c0_i32_0 = arith.constant 0 : i32
    %c0_i32_1 = arith.constant 0 : i32
    return %c0_i32, %c0_i32_0 : i32, i32
  }
}

</mosaic_0001>

<bundles_post_ra>
// kernel: gttn_weight_net_forward.1
= control target key start
LH: loop header
LB: loop body
LE: loop exit
PB: predicated region body
PF: predicated region fallthrough
CT: control target
= control target key end

     0   :  { %12 = vsyncpa [#allocation5], 0  ;;  %s639_s0 = inlined_call_operand.<no memory space> [shape: s32[1], index: 0, kind: input, shape index: {}]   ;;  %s640_s1 = inlined_call_operand.hbm [shape: f32[8,64], index: 1, kind: input, shape index: {}]   ;;  %s641_s2 = inlined_call_operand.hbm [shape: bf16[64,256], index: 2, kind: input, shape index: {}]   ;;  %s642_s3 = inlined_call_operand.vmem [shape: f32[1,256], index: 3, kind: input, shape index: {}]   ;;  %s643_s4 = inlined_call_operand.hbm [shape: bf16[3,256,128], index: 4, kind: input, shape index: {}]   ;;  %s644_s5 = inlined_call_operand.vmem [shape: f32[3,1,128], index: 5, kind: input, shape index: {}]   ;;  %s645_s6 = inlined_call_operand.vmem [shape: f32[8,128], index: 6, kind: output, shape index: {}]  }
   0x1   :  { %13 = vsyncpa [#allocation7], 0  ;;  %s538_s21 = smov [#allocation6]   ;;  %s466_s25 = scalar_lea.hbm %s641_s2, 1024 }
   0x2   :  { %s29_s22 = sshll.u32 %s538_s21, 4  ;;  %p467_p0 = scmp.ne.s32.totalorder %s641_s2, %s466_s25  ;;  %s30_s22 = int_to_ptr.vmem [resolvable:$true] %s29_s22 }
   0x3   :  { %p470_p1 = scmp.lt.u32.totalorder %s466_s25, %s641_s2 }
   0x5   :  { %p472_p2 = pnand %p470_p1, %p467_p0 }
   0x7   :  { %475 = shalt.err (!%p472_p2)
}
   0x8   :  { %s476_s30 = scalar_lea.vmem %s30_s22, 1024  ;;  %p481_p4 = scmp.lt.s32.totalorder %s30_s22, %s30_s22 }
   0x9   :  { %p477_p3 = scmp.ne.s32.totalorder %s30_s22, %s476_s30  ;;  %p482_p5 = scmp.lt.s32.totalorder %s476_s30, %s476_s30 }
   0xb   :  { %p483_p6 = por %p482_p5, %p481_p4 }
   0xd   :  { %p484_p7 = pnand %p483_p6, %p477_p3 }
   0xf   :  { %487 = shalt.err (!%p484_p7)
}
  0x10   :  { %s539_s7 = smov 128   ;;  %s540_s8 = smov 8  }
  0x11   :  { %35 = dma.hbm_to_vmem [thread:$0]  %s641_s2, 1024, %s30_s22, [#allocation7], %s539_s7, %s539_s7, %s540_s8  }
  0x12   :  { %s541_s11 = smov [#allocation4]   ;;  %s407_s15 = sshll.u32 %s639_s0, 11 }
  0x13   :  { %s20_s12 = sshll.u32 %s541_s11, 4  ;;  %s599_s18 = scalar_lea.hbm %s643_s4, %s407_s15  ;;  %s21_s12 = int_to_ptr.vmem [resolvable:$true] %s20_s12 }
  0x14   :  { %s488_s21 = scalar_lea.hbm %s640_s1, 128 }
  0x15   :  { %p489_p8 = scmp.ne.s32.totalorder %s640_s1, %s488_s21  ;;  %p492_p9 = scmp.lt.u32.totalorder %s488_s21, %s640_s1 }
  0x17   :  { %p494_p10 = pnand %p492_p9, %p489_p8 }
  0x19   :  { %497 = shalt.err (!%p494_p10)
}
  0x1a   :  { %s498_s25 = scalar_lea.vmem %s21_s12, 128  ;;  %p503_p12 = scmp.lt.s32.totalorder %s21_s12, %s21_s12 }
  0x1b   :  { %p499_p11 = scmp.ne.s32.totalorder %s21_s12, %s498_s25  ;;  %p504_p13 = scmp.lt.s32.totalorder %s498_s25, %s498_s25 }
  0x1d   :  { %p505_p0 = por %p504_p13, %p503_p12 }
  0x1f   :  { %p506_p1 = pnand %p505_p0, %p499_p11 }
  0x21   :  { %509 = shalt.err (!%p506_p1)
}
  0x22   :  { %23 = dma.hbm_to_vmem [thread:$0]  %s640_s1, 128, %s21_s12, [#allocation5]  }
  0x23   :  { %s542_s28 = smov [#allocation8]   ;;  %s510_s30 = scalar_lea.hbm %s599_s18, 2048 }
  0x24   :  { %s47_s29 = sshll.u32 %s542_s28, 4  ;;  %p511_p2 = scmp.ne.s32.totalorder %s599_s18, %s510_s30  ;;  %s48_s29 = int_to_ptr.vmem [resolvable:$true] %s47_s29 }
  0x25   :  { %s512_s9 = scalar_lea.hbm %s643_s4, 6144  ;;  %p513_p3 = scmp.lt.u32.totalorder %s599_s18, %s643_s4 }
  0x26   :  { %p514_p4 = scmp.lt.u32.totalorder %s512_s9, %s510_s30  ;;  %p516_p6 = scmp.lt.u32.totalorder %s510_s30, %s599_s18 }
  0x28   :  { %p515_p5 = por %p514_p4, %p513_p3 }
  0x2a   :  { %p517_p7 = por %p516_p6, %p515_p5 }
  0x2c   :  { %p518_p8 = pnand %p517_p7, %p511_p2 }
  0x2e   :  { %521 = shalt.err (!%p518_p8)
}
  0x2f   :  { %s522_s1 = scalar_lea.vmem %s48_s29, 2048  ;;  %p527_p10 = scmp.lt.s32.totalorder %s48_s29, %s48_s29 }
  0x30   :  { %p523_p9 = scmp.ne.s32.totalorder %s48_s29, %s522_s1  ;;  %p528_p11 = scmp.lt.s32.totalorder %s522_s1, %s522_s1 }
  0x32   :  { %p529_p12 = por %p528_p11, %p527_p10 }
  0x34   :  { %p530_p13 = pnand %p529_p12, %p523_p9 }
  0x36   :  { %533 = shalt.err (!%p530_p13)
}
  0x37   :  { %s543_s12 = smov 64   ;;  %s544_s13 = smov 4  }
  0x38   :  { %53 = dma.hbm_to_vmem [thread:$0]  %s599_s18, 2048, %s48_s29, [#allocation7], %s543_s12, %s543_s12, %s544_s13  }
  0x39   :  { %534 = dma.done.wait [#allocation5], 128  }
  0x3a   :  { %535 = vsyncadd [#allocation5], 4294967168 }
  0x3b   :  { %536 = dma.done.wait [#allocation7], 3072  }
  0x3c   :  { %537 = vsyncadd [#allocation7], 4294964224  ;;  %v545_v0 = vmov 0   ;;  %v438_v1 = vld [vmem:[#allocation6 + $0x4] ss:$8 sps:$4 sm:$0xff]   ;;  %v454_v13 = vld [vmem:[#allocation8 + $0x50] sm:$0xff]   ;;  %v93_v27 = vlaneseq }
  0x3d   :  { %179 = vmatprep.mubr.bf16.mxu0 %v545_v0  ;;  %v440_v2 = vld [vmem:[#allocation6] ss:$8 sps:$4 sm:$0xff]   ;;  %147 = vmatprep.subr.bf16.mxu0 %v438_v1  ;;  %v441_v3 = vld [vmem:[#allocation6 + $0x14] ss:$8 sps:$4 sm:$0xff]   ;;  %v443_v4 = vld [vmem:[#allocation6 + $0x10] ss:$8 sps:$4 sm:$0xff]  }
  0x3e   :  { %148 = vmatpush1.bf16.msra.mxu0 %v440_v2  ;;  %v444_v5 = vld [vmem:[#allocation6 + $0x24] ss:$8 sps:$4 sm:$0xff]   ;;  %v446_v6 = vld [vmem:[#allocation6 + $0x20] ss:$8 sps:$4 sm:$0xff]   ;;  %v447_v7 = vld [vmem:[#allocation6 + $0x34] ss:$8 sps:$4 sm:$0xff]  }
  0x3f   :  { %149 = vmatprep.subr.bf16.mxu0 %v441_v3  ;;  %v450_v8 = vld [vmem:[#allocation8 + $0x40] sm:$0xff]   ;;  %v452_v10 = vld [vmem:[#allocation8 + $0x48] sm:$0xff]   ;;  %v449_v11 = vld [vmem:[#allocation6 + $0x30] ss:$8 sps:$4 sm:$0xff]   ;;  %vm143_vm0 = vcmask 523264   ;;  %v94_v28 = vshrl.u32 %v93_v27, 7 }
  0x40   :  { %v451_v9 = vld [vmem:[#allocation8] sm:$0xff]   ;;  %408 = vmatprep.subr.bf16.mxu1 %v450_v8  ;;  %v453_v12 = vld [vmem:[#allocation8 + $0x8] sm:$0xff]   ;;  %v81_v14 = vld [vmem:[#allocation4] sm:$0xff]  ;;  %p76_p0 = scmp.lt.s32.totalorder %s639_s0, 2 }
  0x41   :  { %409 = vmatpush3.bf16.msra.mxu1 %v451_v9  ;;  %v455_v15 = vld [vmem:[#allocation8 + $0x10] sm:$0xff]   ;;  %v82_v16 = vpack.c.bf16 %v81_v14, %v81_v14  ;;  %v456_v17 = vld [vmem:[#allocation8 + $0x58] sm:$0xff]   ;;  %v458_v19 = vld [vmem:[#allocation8 + $0x60] sm:$0xff]   ;;  %v95_v29 = vsub.s32 0, %v94_v28  ;;  %v99_v31 = vsub.s32 1, %v94_v28 }
  0x42   :  { %150 = vmatpush1.bf16.msra.mxu0 %v443_v4  ;;  %410 = vmatprep.subr.bf16.mxu1 %v452_v10  ;;  %v457_v18 = vld [vmem:[#allocation8 + $0x18] sm:$0xff]   ;;  %v459_v20 = vld [vmem:[#allocation8 + $0x20] sm:$0xff]   ;;  %v460_v21 = vld [vmem:[#allocation8 + $0x68] sm:$0xff]   ;;  %s647_s0 = smov (!%p76_p0, %s639_s0), 2 }
  0x43   :  { %151 = vmatprep.subr.bf16.mxu0 %v444_v5  ;;  %v461_v22 = vld [vmem:[#allocation8 + $0x28] sm:$0xff]   ;;  %v462_v23 = vld [vmem:[#allocation8 + $0x70] sm:$0xff]   ;;  %v464_v25 = vld [vmem:[#allocation8 + $0x78] sm:$0xff]   ;;  %s78_s20 = scalar_lea.vmem %s644_s5, %s647_s0 }
  0x44   :  { %v463_v24 = vld [vmem:[#allocation8 + $0x30] sm:$0xff]   ;;  %v465_v26 = vld [vmem:[#allocation8 + $0x38] sm:$0xff]  }
  0x45   :  { %411 = vmatpush3.bf16.msra.mxu1 %v453_v12  ;;  %v91_v30 = vld [vmem:[%s642_s3] sm:$0x3] }
  0x46   :  { %152 = vmatpush1.bf16.msra.mxu0 %v446_v6  ;;  %412 = vmatprep.subr.bf16.mxu1 %v454_v13  ;;  %v96_v32 = vrot.slane %v91_v30, %v95_v29  ;;  %v100_v33 = vrot.slane %v91_v30, %v99_v31  ;;  %v390_v45 = vld [vmem:[%s78_s20] ss:$0 sm:$0xff] }
  0x47   :  { %153 = vmatprep.subr.bf16.mxu0 %v447_v7 }
  0x49   :  { %413 = vmatpush3.bf16.msra.mxu1 %v455_v15 }
  0x4a   :  { %154 = vmatpush1.bf16.msra.mxu0 %v449_v11  ;;  %414 = vmatprep.subr.bf16.mxu1 %v456_v17 }
  0x4d   :  { %389 = vmatmul.mubr.msk.bf16.vlgmr.msra.gmra.mrb[0].mxu0 %vm143_vm0, %v82_v16  ;;  %415 = vmatpush3.bf16.msra.mxu1 %v457_v18 }
  0x4e   :  { %416 = vmatprep.subr.bf16.mxu1 %v458_v19 }
  0x51   :  { %417 = vmatpush3.bf16.msra.mxu1 %v459_v20 }
  0x52   :  { %418 = vmatprep.subr.bf16.mxu1 %v460_v21 }
  0x55   :  { %419 = vmatpush3.bf16.msra.mxu1 %v461_v22 }
  0x56   :  { %420 = vmatprep.subr.bf16.mxu1 %v462_v23 }
  0x59   :  { %421 = vmatpush3.bf16.msra.mxu1 %v463_v24 }
  0x5a   :  { %422 = vmatprep.subr.bf16.mxu1 %v464_v25 }
  0x5d   :  { %423 = vmatpush3.bf16.msra.mxu1 %v465_v26 }
 0x120   :  { %v181_v34 = vpop.f32.mrb[0].mxu0 }
 0x121   :  { %v182_v35 = vadd.f32 %v181_v34, %v96_v32  ;;  %v183_v36 = vpop.f32.mrb[1].mxu0 }
 0x122   :  { %v184_v37 = vadd.f32 %v183_v36, %v100_v33  ;;  %v185_v38 = vpop.f32.mrb[2].mxu0 }
 0x123   :  { %v188_v39 = vmax.f32 %v182_v35, 0.0  ;;  %v186_v40 = vpop.f32.mrb[3].mxu0 }
 0x124   :  { %v189_v41 = vmax.f32 %v184_v37, 0.0 }
 0x125   :  { %v190_v43 = vpack.c.bf16 %v188_v39, %v188_v39 }
 0x126   :  { %v191_v42 = vpack.c.bf16 %v189_v41, %v189_v41 }
 0x128   :  { %359 = vmatprep.mubr.bf16.mxu1 %v191_v42 }
 0x129   :  { %360 = vmatmul.mubr.bf16.vlgmr.msra.gmra.mrb[0].mxu1 %v190_v43 }
 0x1fc   :  { %v424_v44 = vpop.f32.mrb[0].mxu1 }
 0x1fd   :  { %v425_v46 = vpop.f32.mrb[1].mxu1 }
 0x1fe   :  { %v426_v47 = vadd.f32 %v425_v46, %v424_v44  ;;  %v427_v48 = vpop.f32.mrb[2].mxu1 }
 0x1ff   :  { %v428_v49 = vpop.f32.mrb[3].mxu1 }
 0x200   :  { %v362_v50 = vadd.f32 %v426_v47, %v390_v45 }
 0x202   :  { %367 = vst [vmem:[%s645_s6] sm:$0xff] %v362_v50 }
 0x203   :  { %372 = vsyncpa [#allocation5], 1 }
 0x204   :  { %373 = vsyncpa [#allocation7], 1 }

</bundles_post_ra>
